<compile_context>
chip_gen: v6e
topology: v6e:2x2x1
jax: 0.10.0
libtpu: 0.0.40
codegen_flags: <defaults>
</compile_context>

<pallas_src>
import functools

import jax
import jax.numpy as jnp
from jax.experimental import pallas as pl
from jax.experimental.pallas import tpu as pltpu

_LANES = 128
_SUBLANES = 8
_NUM_CORES = 2  # outer "parallel" grid dim; exploits both TCs on v7x, harmless elsewhere


def _focal_loss_kernel(pred_ref, gt_ref, loss_acc_ref, npos_acc_ref, *,
                       n_valid, tile_rows, steps_per_core):
    c = pl.program_id(0)   # core split      ("parallel")
    i = pl.program_id(1)   # streaming step  ("arbitrary", carried accumulators)

    @pl.when(i == 0)
    def _():
        loss_acc_ref[...] = jnp.zeros_like(loss_acc_ref)
        npos_acc_ref[...] = jnp.zeros_like(npos_acc_ref)

    pred = pred_ref[...].astype(jnp.float32)
    gt = gt_ref[...].astype(jnp.float32)

    # ---- tail / out-of-range mask --------------------------------------
    # Use the UNclamped global block index (the index_map clamps only the DMA
    # source); anything at/after element n_valid contributes exactly zero.
    blk = c * steps_per_core + i
    row_ids = jax.lax.broadcasted_iota(jnp.int32, (tile_rows, _LANES), 0)
    lane_ids = jax.lax.broadcasted_iota(jnp.int32, (tile_rows, _LANES), 1)
    global_row = blk * tile_rows + row_ids
    n_full_rows = n_valid // _LANES
    n_rem = n_valid % _LANES
    valid = jnp.logical_or(
        global_row < n_full_rows,
        jnp.logical_and(global_row == n_full_rows, lane_ids < n_rem))

    pos_mask = jnp.logical_and(gt == 1.0, valid)   # gt == 1
    neg_mask = jnp.logical_and(gt < 1.0, valid)    # gt <  1

    one_m_pred = 1.0 - pred
    one_m_gt = 1.0 - gt

    # Fused single-log form of the CornerNet focal loss:
    #   pos:  log(pred)     * (1 - pred)^2
    #   neg:  log(1 - pred) * pred^2 * (1 - gt)^4
    log_arg = jnp.where(pos_mask, pred, one_m_pred)
    # keep masked / garbage (OOB-block) lanes finite: log(1) * 0 == 0
    log_arg = jnp.where(jnp.logical_or(pos_mask, neg_mask), log_arg, 1.0)
    neg_w = one_m_gt * one_m_gt
    neg_w = neg_w * neg_w
    w = jnp.where(pos_mask, one_m_pred * one_m_pred,
                  jnp.where(neg_mask, pred * pred * neg_w, 0.0))
    loss_elem = jnp.log(log_arg) * w               # pos_loss + neg_loss, per element

    # ---- per-tile partial reduction: (tile_rows,128) -> (8,128) via VALU adds
    groups = tile_rows // _SUBLANES
    loss_acc_ref[...] += loss_elem.reshape(groups, _SUBLANES, _LANES).sum(axis=0)
    npos_acc_ref[...] += pos_mask.astype(jnp.float32).reshape(
        groups, _SUBLANES, _LANES).sum(axis=0)


def focal_loss(pred: jax.Array, gt: jax.Array) -> jax.Array:
    """Pallas TPU version of CornerNet `_neg_loss(pred, gt)`. Returns a scalar."""
    assert pred.shape == gt.shape
    n = int(pred.size)

    # Keep native dtypes on the wire (no wrapper-side f32 materialization).
    pred_flat = pred.reshape(-1)
    gt_flat = gt.reshape(-1)

    # Lane-dense (rows, 128) slab; pad only up to the next (8*128)-aligned
    # length (<= 1023 elements).  The ragged tail is masked inside the kernel.
    rows = -(-n // _LANES)
    rows = -(-rows // _SUBLANES) * _SUBLANES
    n_slab = rows * _LANES
    if n_slab != n:
        pred_flat = jnp.pad(pred_flat, (0, n_slab - n))
        gt_flat = jnp.pad(gt_flat, (0, n_slab - n))
    pred2d = pred_flat.reshape(rows, _LANES)
    gt2d = gt_flat.reshape(rows, _LANES)

    # Tile size: largest that keeps double-buffered input blocks around ~8 MiB
    # of VMEM (within the default scoped-VMEM limit on v5e/v6e/v7x).
    bytes_per_row = _LANES * (pred2d.dtype.itemsize + gt2d.dtype.itemsize)
    budget_bytes = 8 * 1024 * 1024
    max_rows = max(_SUBLANES,
                   (budget_bytes // (2 * bytes_per_row)) // _SUBLANES * _SUBLANES)
    tile_rows = min(rows, max_rows)

    nblocks = -(-rows // tile_rows)
    steps_per_core = -(-nblocks // _NUM_CORES)

    def in_map(c, i):
        # Clamp so an over-hanging (core, step) re-reads a valid block; its
        # contribution is masked to exactly zero in the kernel body.
        return (jnp.minimum(c * steps_per_core + i, nblocks - 1), 0)

    acc_shape = jax.ShapeDtypeStruct((_NUM_CORES * _SUBLANES, _LANES), jnp.float32)
    kernel = functools.partial(_focal_loss_kernel, n_valid=n,
                               tile_rows=tile_rows, steps_per_core=steps_per_core)

    loss_parts, npos_parts = pl.pallas_call(
        kernel,
        out_shape=(acc_shape, acc_shape),
        grid=(_NUM_CORES, steps_per_core),
        in_specs=[
            pl.BlockSpec((tile_rows, _LANES), in_map),
            pl.BlockSpec((tile_rows, _LANES), in_map),
        ],
        out_specs=(
            pl.BlockSpec((_SUBLANES, _LANES), lambda c, i: (c, 0)),
            pl.BlockSpec((_SUBLANES, _LANES), lambda c, i: (c, 0)),
        ),
        compiler_params=pltpu.CompilerParams(
            dimension_semantics=("parallel", "arbitrary")),
        cost_estimate=pl.CostEstimate(
            flops=12 * n,
            transcendentals=n,
            bytes_accessed=(pred2d.size * pred2d.dtype.itemsize
                            + gt2d.size * gt2d.dtype.itemsize)),
    )(pred2d, gt2d)

    loss_sum = jnp.sum(loss_parts)   # = pos_loss + neg_loss
    num_pos = jnp.sum(npos_parts)

    # loss = -neg_loss                       if num_pos == 0 (pos_loss is 0 then)
    #      = -(pos_loss + neg_loss)/num_pos  otherwise
    return jnp.where(num_pos == 0.0, -loss_sum,
                     -loss_sum / jnp.maximum(num_pos, 1.0))


def _focal_loss_ref(pred, gt):
    """Pure-JAX reference mirroring the PyTorch `_neg_loss` (f32 math)."""
    pred = pred.astype(jnp.float32)
    gt = gt.astype(jnp.float32)
    pos_inds = (gt == 1.0).astype(jnp.float32)
    neg_inds = (gt < 1.0).astype(jnp.float32)
    neg_weights = jnp.power(1.0 - gt, 4)
    pos_loss = jnp.log(pred) * jnp.power(1.0 - pred, 2) * pos_inds
    neg_loss = jnp.log(1.0 - pred) * jnp.power(pred, 2) * neg_weights * neg_inds
    num_pos = pos_inds.sum()
    pos_loss = pos_loss.sum()
    neg_loss = neg_loss.sum()
    return jnp.where(num_pos == 0.0,
                     -neg_loss,
                     -(pos_loss + neg_loss) / jnp.maximum(num_pos, 1.0))


if __name__ == "__main__":
    key = jax.random.PRNGKey(0)
    k_pred, k_gt, k_pred2, k_gt2 = jax.random.split(key, 4)

    # --- test 1: f32, lane/sublane-aligned shape -------------------------
    B, C, H, W = 2, 4, 16, 16
    pred = jax.random.uniform(k_pred, (B, C, H, W), dtype=jnp.float32,
                              minval=1e-4, maxval=1.0 - 1e-4)
    gt = jax.random.uniform(k_gt, (B, C, H, W), dtype=jnp.float32,
                            minval=0.0, maxval=0.999)
    gt = gt.at[:, :, ::8, ::8].set(1.0)

    loss = focal_loss(pred, gt)
    jax.block_until_ready(loss)
    expected = _focal_loss_ref(pred, gt)
    assert loss.shape == ()
    assert bool(jnp.allclose(loss, expected, rtol=1e-5, atol=1e-6)), (loss, expected)

    # --- test 2: bf16 inputs, ragged size (exercises in-kernel tail mask) --
    shape2 = (2, 3, 13, 17)
    pred2 = jax.random.uniform(k_pred2, shape2, dtype=jnp.float32,
                               minval=1e-3, maxval=1.0 - 1e-3).astype(jnp.bfloat16)
    gt2 = jax.random.uniform(k_gt2, shape2, dtype=jnp.float32,
                             minval=0.0, maxval=0.99).astype(jnp.bfloat16)
    gt2 = gt2.at[:, :, ::6, ::6].set(1.0)

    loss2 = focal_loss(pred2, gt2)
    jax.block_until_ready(loss2)
    expected2 = _focal_loss_ref(pred2, gt2)
    assert bool(jnp.allclose(loss2, expected2, rtol=1e-4, atol=1e-5)), (loss2, expected2)

    print("KERNEL_OK")
</pallas_src>

<mosaic_0001>
module attributes {stable_mosaic.version = 11 : i64} {
  func.func @_focal_loss_kernel(%arg0: i32, %arg1: i32, %arg2: memref<16x128xf32, #tpu.memory_space<vmem>>, %arg3: memref<16x128xf32, #tpu.memory_space<vmem>>, %arg4: memref<8x128xf32, #tpu.memory_space<vmem>>, %arg5: memref<8x128xf32, #tpu.memory_space<vmem>>) attributes {dimension_semantics = [#tpu.dimension_semantics<parallel>, #tpu.dimension_semantics<arbitrary>], iteration_bounds = array<i64: 2, 1>, scalar_prefetch = 0 : i64, scratch_operands = 0 : i64, tpu.core_type = #tpu.core_type<tc>, window_params = [{transform_indices = @transform_0, window_bounds = array<i64: 16, 128>}, {transform_indices = @transform_1, window_bounds = array<i64: 16, 128>}, {transform_indices = @transform_2, window_bounds = array<i64: 8, 128>}, {transform_indices = @transform_3, window_bounds = array<i64: 8, 128>}]} {
    %c0_i32 = arith.constant 0 : i32
    %0 = arith.cmpi eq, %arg1, %c0_i32 : i32
    %1 = arith.extui %0 : i1 to i32
    %c0_i32_0 = arith.constant 0 : i32
    %2 = arith.cmpi ne, %1, %c0_i32_0 : i32
    scf.if %2 {
      %cst_22 = arith.constant 0.000000e+00 : f32
      %56 = vector.broadcast %cst_22 : f32 to vector<8x128xf32>
      %c0_23 = arith.constant 0 : index
      %c0_24 = arith.constant 0 : index
      %57 = vector.load %arg4[%c0_23, %c0_24] : memref<8x128xf32, #tpu.memory_space<vmem>>, vector<8x128xf32>
      tpu.vector_store %arg4[%c0_23, %c0_24], %56 {strides = array<i32>} : memref<8x128xf32, #tpu.memory_space<vmem>>, vector<8x128xf32>,
      %cst_25 = arith.constant 0.000000e+00 : f32
      %58 = vector.broadcast %cst_25 : f32 to vector<8x128xf32>
      %c0_26 = arith.constant 0 : index
      %c0_27 = arith.constant 0 : index
      %59 = vector.load %arg5[%c0_26, %c0_27] : memref<8x128xf32, #tpu.memory_space<vmem>>, vector<8x128xf32>
      tpu.vector_store %arg5[%c0_26, %c0_27], %58 {strides = array<i32>} : memref<8x128xf32, #tpu.memory_space<vmem>>, vector<8x128xf32>,
    } else {
    }
    %c0 = arith.constant 0 : index
    %c0_1 = arith.constant 0 : index
    %3 = vector.load %arg2[%c0, %c0_1] : memref<16x128xf32, #tpu.memory_space<vmem>>, vector<16x128xf32>
    %c0_2 = arith.constant 0 : index
    %c0_3 = arith.constant 0 : index
    %4 = vector.load %arg3[%c0_2, %c0_3] : memref<16x128xf32, #tpu.memory_space<vmem>>, vector<16x128xf32>
    %c1_i32 = arith.constant 1 : i32
    %5 = arith.muli %arg0, %c1_i32 : i32
    %6 = arith.addi %5, %arg1 : i32
    %7 = tpu.iota {dimensions = array<i32: 0>} : vector<16x128xi32>
    %8 = tpu.iota {dimensions = array<i32: 1>} : vector<16x128xi32>
    %c16_i32 = arith.constant 16 : i32
    %9 = arith.muli %6, %c16_i32 : i32
    %10 = vector.broadcast %9 : i32 to vector<16x128xi32>
    %11 = arith.addi %10, %7 : vector<16x128xi32>
    %c16_i32_4 = arith.constant 16 : i32
    %12 = vector.broadcast %c16_i32_4 : i32 to vector<16x128xi32>
    %13 = arith.cmpi slt, %11, %12 : vector<16x128xi32>
    %c16_i32_5 = arith.constant 16 : i32
    %14 = vector.broadcast %c16_i32_5 : i32 to vector<16x128xi32>
    %15 = arith.cmpi eq, %11, %14 : vector<16x128xi32>
    %c0_i32_6 = arith.constant 0 : i32
    %16 = vector.broadcast %c0_i32_6 : i32 to vector<16x128xi32>
    %17 = arith.cmpi slt, %8, %16 : vector<16x128xi32>
    %18 = arith.andi %15, %17 : vector<16x128xi1>
    %19 = arith.ori %13, %18 : vector<16x128xi1>
    %cst = arith.constant 1.000000e+00 : f32
    %20 = vector.broadcast %cst : f32 to vector<16x128xf32>
    %21 = arith.cmpf oeq, %4, %20 : vector<16x128xf32>
    %22 = arith.andi %21, %19 : vector<16x128xi1>
    %cst_7 = arith.constant 1.000000e+00 : f32
    %23 = vector.broadcast %cst_7 : f32 to vector<16x128xf32>
    %24 = arith.cmpf olt, %4, %23 : vector<16x128xf32>
    %25 = arith.andi %24, %19 : vector<16x128xi1>
    %cst_8 = arith.constant 1.000000e+00 : f32
    %26 = vector.broadcast %cst_8 : f32 to vector<16x128xf32>
    %27 = arith.subf %26, %3 : vector<16x128xf32>
    %cst_9 = arith.constant 1.000000e+00 : f32
    %28 = vector.broadcast %cst_9 : f32 to vector<16x128xf32>
    %29 = arith.subf %28, %4 : vector<16x128xf32>
    %30 = arith.select %22, %3, %27 : vector<16x128xi1>, vector<16x128xf32>
    %31 = arith.ori %22, %25 : vector<16x128xi1>
    %cst_10 = arith.constant 1.000000e+00 : f32
    %32 = vector.broadcast %cst_10 : f32 to vector<16x128xf32>
    %33 = arith.select %31, %30, %32 : vector<16x128xi1>, vector<16x128xf32>
    %34 = arith.mulf %29, %29 : vector<16x128xf32>
    %35 = arith.mulf %34, %34 : vector<16x128xf32>
    %36 = arith.mulf %27, %27 : vector<16x128xf32>
    %37 = arith.mulf %3, %3 : vector<16x128xf32>
    %38 = arith.mulf %37, %35 : vector<16x128xf32>
    %cst_11 = arith.constant 0.000000e+00 : f32
    %39 = vector.broadcast %cst_11 : f32 to vector<16x128xf32>
    %40 = arith.select %25, %38, %39 : vector<16x128xi1>, vector<16x128xf32>
    %41 = arith.select %22, %36, %40 : vector<16x128xi1>, vector<16x128xf32>
    %42 = math.log %33 : vector<16x128xf32>
    %43 = arith.mulf %42, %41 : vector<16x128xf32>
    %c0_12 = arith.constant 0 : index
    %c0_13 = arith.constant 0 : index
    %44 = vector.load %arg4[%c0_12, %c0_13] : memref<8x128xf32, #tpu.memory_space<vmem>>, vector<8x128xf32>
    %45 = vector.shape_cast %43 : vector<16x128xf32> to vector<2x8x128xf32>
    %cst_14 = arith.constant dense<0.000000e+00> : vector<8x128xf32>
    %46 = vector.multi_reduction <add>, %45, %cst_14 [0] : vector<2x8x128xf32> to vector<8x128xf32>
    %47 = arith.addf %44, %46 : vector<8x128xf32>
    %c0_15 = arith.constant 0 : index
    %c0_16 = arith.constant 0 : index
    %48 = vector.load %arg4[%c0_15, %c0_16] : memref<8x128xf32, #tpu.memory_space<vmem>>, vector<8x128xf32>
    tpu.vector_store %arg4[%c0_15, %c0_16], %47 {strides = array<i32>} : memref<8x128xf32, #tpu.memory_space<vmem>>, vector<8x128xf32>,
    %c0_17 = arith.constant 0 : index
    %c0_18 = arith.constant 0 : index
    %49 = vector.load %arg5[%c0_17, %c0_18] : memref<8x128xf32, #tpu.memory_space<vmem>>, vector<8x128xf32>
    %50 = arith.extui %22 : vector<16x128xi1> to vector<16x128xi32>
    %51 = arith.sitofp %50 : vector<16x128xi32> to vector<16x128xf32>
    %52 = vector.shape_cast %51 : vector<16x128xf32> to vector<2x8x128xf32>
    %cst_19 = arith.constant dense<0.000000e+00> : vector<8x128xf32>
    %53 = vector.multi_reduction <add>, %52, %cst_19 [0] : vector<2x8x128xf32> to vector<8x128xf32>
    %54 = arith.addf %49, %53 : vector<8x128xf32>
    %c0_20 = arith.constant 0 : index
    %c0_21 = arith.constant 0 : index
    %55 = vector.load %arg5[%c0_20, %c0_21] : memref<8x128xf32, #tpu.memory_space<vmem>>, vector<8x128xf32>
    tpu.vector_store %arg5[%c0_20, %c0_21], %54 {strides = array<i32>} : memref<8x128xf32, #tpu.memory_space<vmem>>, vector<8x128xf32>,
    return
  }
  func.func @transform_0(%arg0: i32, %arg1: i32) -> (i32, i32) {
    %c1_i32 = arith.constant 1 : i32
    %0 = arith.muli %arg0, %c1_i32 : i32
    %1 = arith.addi %0, %arg1 : i32
    %c0_i32 = arith.constant 0 : i32
    %2 = arith.minsi %1, %c0_i32 : i32
    %c0_i32_0 = arith.constant 0 : i32
    %c0_i32_1 = arith.constant 0 : i32
    return %2, %c0_i32_0 : i32, i32
  }
  func.func @transform_1(%arg0: i32, %arg1: i32) -> (i32, i32) {
    %c1_i32 = arith.constant 1 : i32
    %0 = arith.muli %arg0, %c1_i32 : i32
    %1 = arith.addi %0, %arg1 : i32
    %c0_i32 = arith.constant 0 : i32
    %2 = arith.minsi %1, %c0_i32 : i32
    %c0_i32_0 = arith.constant 0 : i32
    %c0_i32_1 = arith.constant 0 : i32
    return %2, %c0_i32_0 : i32, i32
  }
  func.func @transform_2(%arg0: i32, %arg1: i32) -> (i32, i32) {
    %c0_i32 = arith.constant 0 : i32
    %c0_i32_0 = arith.constant 0 : i32
    return %arg0, %c0_i32 : i32, i32
  }
  func.func @transform_3(%arg0: i32, %arg1: i32) -> (i32, i32) {
    %c0_i32 = arith.constant 0 : i32
    %c0_i32_0 = arith.constant 0 : i32
    return %arg0, %c0_i32 : i32, i32
  }
}

</mosaic_0001>

<bundles_post_ra>
// kernel: tpu_custom_call.1
= control target key start
LH: loop header
LB: loop body
LE: loop exit
PB: predicated region body
PF: predicated region fallthrough
CT: control target
= control target key end

     0   :  { %9 = vsyncpa [#allocation3], 0  ;;  %s1140_s0 = inlined_call_operand.hbm [shape: f32[16,128], index: 0, kind: input, shape index: {}]   ;;  %s1141_s1 = inlined_call_operand.hbm [shape: f32[16,128], index: 1, kind: input, shape index: {}]   ;;  %s1142_s2 = inlined_call_operand.hbm [shape: f32[16,128], index: 2, kind: output, shape index: {0}]   ;;  %s1143_s3 = inlined_call_operand.hbm [shape: f32[16,128], index: 3, kind: output, shape index: {1}]  }
   0x1   :  { %11 = vsyncpa [#allocation3 + $0x1], 0 }
   0x2   :  { %12 = vsyncpa [#allocation6], 0 }
   0x3   :  { %14 = vsyncpa [#allocation6 + $0x1], 0 }
   0x4   :  { %15 = vsyncpa [#allocation4], 0 }
   0x5   :  { %17 = vsyncpa [#allocation4 + $0x1], 0 }
   0x6   :  { %18 = vsyncpa [#allocation9], 0 }
   0x7   :  { %20 = vsyncpa [#allocation9 + $0x1], 0  ;;  %s871_s12 = smov 0   ;;  %s873_s13 = smov 0  }
   0x8   :  { %s875_s14 = smov 0   ;;  %s877_s15 = smov 0  }
   0x9   :  { %s879_s16 = smov 0   ;;  %s881_s17 = smov 0  }
   0xa   :  { %s883_s18 = smov 0   ;;  %s885_s19 = smov 0  }
   0xb LB: > { %s522_s20 = sadd.s32 4294967295, %s842_s19   ;;  %s523_s21 = sadd.s32 4294967294, %s842_s19   ;;  %s842_s19 = sphi %s885_s19, %s26_s19   ;;  %s838_s18 = sphi %s883_s18, %s1170_s18   ;;  %s834_s17 = sphi %s881_s17, %s1169_s17   ;;  %s830_s16 = sphi %s879_s16, %s1130_s16   ;;  %s826_s15 = sphi %s877_s15, %s1168_s15   ;;  %s822_s14 = sphi %s875_s14, %s1167_s14   ;;  %s818_s13 = sphi %s873_s13, %s1166_s13   ;;  %s814_s12 = sphi %s871_s12, %s1165_s12  }
   0xc   : > { %s38_s22 = sadd.s32 1, %s838_s18  ;;  %p811_p1 = scmp.ne.s32.totalorder %s830_s16, 0 }
   0xd   : > { %p40_p0 = scmp.ge.s32.totalorder %s38_s22, 2  ;;  %p59_p2 = scmp.eq.s32.totalorder %s842_s19, 0 }
   0xe   : > { %p64_p3 = scmp.ne.s32.totalorder %s830_s16, %s826_s15  ;;  %p65_p5 = scmp.eq.s32.totalorder %s522_s20, 0 }
   0xf   : > { %s1172_s22 = smov (%p40_p0, %s38_s22), 0  ;;  %p917_p4 = por %p811_p1, %p59_p2 }
  0x10   : > { %p921_p6 = por %p65_p5, %p64_p3  ;;  %s106_s25 = ssub.s32 %s838_s18, %s1172_s22 }
  0x11   : > { %p107_p7 = scmp.eq.s32.totalorder %s106_s25, 0  ;;  %s109_s26 = sadd.s32 1, %s822_s14 }
  0x12   : > { %s1147_s24 = scalar_select %p921_p6, 1, 0 }
  0x13   : > { %s929_s27 = scalar_select %p107_p7, %s822_s14, %s109_s26  }
  0x14   : > { %p119_p8 = scmp.ne.s32.totalorder %s822_s14, %s818_s13  ;;  %p120_p9 = scmp.eq.s32.totalorder %s522_s20, 1 }
  0x15   : > { %p125_p10 = scmp.ne.s32.totalorder %s818_s13, %s814_s12  ;;  %p126_p11 = scmp.eq.s32.totalorder %s523_s21, 1 }
  0x16   : > { %p935_p12 = por %p120_p9, %p119_p8  ;;  %p570_p1 = scmp.lt.s32.totalorder %s842_s19, 2 }
  0x17   : > { %p940_p0 = por %p126_p11, %p125_p10  ;;  %s844_s30 = smov [#allocation2]  }
  0x18   : > { %s1148_s28 = scalar_select %p935_p12, 1, 0 }
  0x19   : > { %s1149_s29 = scalar_select %p940_p0, 1, 0 }
  0x1a   : > { %s186_s4 = sshll.u32 %s844_s30, 4  ;;  %p947_p2 = pnand %p570_p1, %p917_p4  ;;  %s187_s4 = int_to_ptr.vmem [resolvable:$true] %s186_s4 }
  0x1b   : > { %s651_s8 = scalar_lea.hbm %s1140_s0, 256 }
  0x1c   : > { %p652_p3 = scmp.ne.s32.totalorder %s1140_s0, %s651_s8  ;;  %p653_p5 = pneg %p947_p2 }
  0x1d   : > { %p658_p8 = scmp.lt.s32.totalorder %s651_s8, %s651_s8 }
  0x1e   : > { %p654_p7 = pnand %p653_p5, %p652_p3 }
  0x20   : > { %p655_p4 = pneg %p654_p7 }
  0x22   : > { %p660_p9 = pnand %p658_p8, %p655_p4 }
  0x24   : > { %663 = shalt.err (!%p660_p9)
}
  0x25   : > { %s664_s11 = scalar_lea.vmem %s187_s4, 256  ;;  %s671_s15 = scalar_lea.vmem %s187_s4, 512 }
  0x26   : > { %p665_p10 = scmp.ne.s32.totalorder %s187_s4, %s664_s11  ;;  %p672_p13 = scmp.lt.s32.totalorder %s187_s4, %s187_s4 }
  0x27   : > { %p673_p0 = scmp.lt.s32.totalorder %s671_s15, %s664_s11 }
  0x28   : > { %p667_p11 = pnand %p665_p10, %p653_p5 }
  0x29   : > { %p674_p12 = por %p673_p0, %p672_p13 }
  0x2a   : > { %p668_p1 = pneg %p667_p11 }
  0x2c   : > { %p675_p6 = pnand %p674_p12, %p668_p1 }
  0x2e   : > { %678 = shalt.err (!%p675_p6)
}
  0x2f   : > { %s845_s20 = smov 128   ;;  %s846_s21 = smov 8  }
  0x30   : > { %559 = dma.hbm_to_vmem [thread:$0]  (!%p947_p2), %s1140_s0, 256, %s187_s4, [#allocation3], %s845_s20, %s845_s20, %s846_s21  }
  0x31   : > { %p532_p3 = scmp.ge.s32.totalorder %s842_s19, 1  ;;  %p218_p7 = scmp.lt.s32.totalorder %s842_s19, 3 }
  0x32   : > { %s847_s30 = smov [#allocation5]   ;;  %s679_s9 = scalar_lea.hbm %s1141_s1, 256 }
  0x33   : > { %p972_p4 = pnand %p532_p3, %p218_p7  ;;  %s210_s6 = sshll.u32 %s847_s30, 4  ;;  %s211_s6 = int_to_ptr.vmem [resolvable:$true] %s210_s6 }
  0x34   : > { %p680_p6 = scmp.ne.s32.totalorder %s1141_s1, %s679_s9  ;;  %p686_p0 = scmp.lt.s32.totalorder %s679_s9, %s679_s9 }
  0x35   : > { %s1151_s26 = scalar_select %p972_p4, 1, 0 }
  0x36   : > { %p682_p12 = pnand %p680_p6, %p653_p5 }
  0x38   : > { %p683_p13 = pneg %p682_p12 }
  0x3a   : > { %p688_p8 = pnand %p686_p0, %p683_p13 }
  0x3c   : > { %691 = shalt.err (!%p688_p8)
}
  0x3d   : > { %s692_s4 = scalar_lea.vmem %s211_s6, 256  ;;  %s699_s15 = scalar_lea.vmem %s211_s6, 512 }
  0x3e   : > { %p693_p9 = scmp.ne.s32.totalorder %s211_s6, %s692_s4  ;;  %p700_p1 = scmp.lt.s32.totalorder %s211_s6, %s211_s6 }
  0x3f   : > { %p701_p3 = scmp.lt.s32.totalorder %s699_s15, %s692_s4 }
  0x40   : > { %p695_p10 = pnand %p693_p9, %p653_p5 }
  0x41   : > { %p702_p7 = por %p701_p3, %p700_p1 }
  0x42   : > { %p696_p11 = pneg %p695_p10 }
  0x44   : > { %p703_p4 = pnand %p702_p7, %p696_p11 }
  0x46   : > { %706 = shalt.err (!%p703_p4)
}
  0x47   : > { %562 = dma.hbm_to_vmem [thread:$0]  (!%p947_p2), %s1141_s1, 256, %s211_s6, [#allocation6], %s845_s20, %s845_s20, %s846_s21  }
  0x48   : > { %p1152_p6 = scmp.ne.s32.totalorder %s1151_s26, 0 }
  0x49   : > { %s224_s30 = sand.u32 (!%p1152_p6), 1, %s830_s16   ;;  %p1153_p5 = scmp.ne.s32.totalorder (!%p1152_p6), %s1147_s24, 0 }
  0x4a   : > { %222 = sbr.rel (%p1152_p6) target bundleno = 132 (0x84), region = 28  ;;  %s533_s7 = sshll.u32 (!%p1152_p6), %s224_s30, 4 }
  0x4b   : > { %s225_s8 = scalar_lea.sflag (!%p1152_p6), [#allocation3], %s224_s30  ;;  %s228_s9 = scalar_lea.vmem (!%p1152_p6), [#allocation2], %s533_s7 }
  0x4f   : > { %796 = dma.done.wait (%p1153_p5), %s225_s8, 256  }
  0x50   : > { %798 = vsyncadd (%p1153_p5), %s225_s8, 4294967040  ;;  %s234_s5 = scalar_lea.sflag [#allocation6], %s224_s30  ;;  %s237_s10 = scalar_lea.vmem [#allocation5], %s533_s7 }
  0x51   : > { %800 = dma.done.wait (%p1153_p5), %s234_s5, 256  }
  0x52   : > { %802 = vsyncadd (%p1153_p5), %s234_s5, 4294967040  ;;  %v289_v0 = vlaneseq  ;;  %s537_s20 = sshll.u32 %s834_s17, 4  ;;  %s1006_s21 = sand.u32 1, %s818_s13   ;;  %v284_v6 = vld [vmem:[%s228_s9] sm:$0xff]  ;;  %v1009_v7 = vld [vmem:[%s228_s9 + $0x8] sm:$0xff]  ;;  %v848_v16 = vmov 0.0  }
  0x53   : > { %v295_v1 = vstv %s537_s20  ;;  %s535_s26 = sshll.u32 %s1006_s21, 3  ;;  %v286_v8 = vld [vmem:[%s237_s10] sm:$0xff]  ;;  %v287_v9 = vld [vmem:[%s237_s10 + $0x8] sm:$0xff]  ;;  %v315_v10 = vsub.f32 1.0, %v284_v6  ;;  %v316_v12 = vsub.f32 1.0, %v1009_v7  ;;  %s542_s24 = sshll.u32 %s834_s17, 7  ;;  %v331_v29 = vmul.f32 %v284_v6, %v284_v6 }
  0x54   : > { %v290_v2 = vshrl.u32 %v289_v0, 7  ;;  %vm307_vm2 = vcmp.eq.f32.partialorder %v286_v8, 1.0  ;;  %vm311_vm3 = vcmp.lt.f32.partialorder %v286_v8, 1.0  ;;  %vm308_vm4 = vcmp.eq.f32.partialorder %v287_v9, 1.0  ;;  %s269_s6 = scalar_lea.vmem [#allocation8], %s535_s26  ;;  %s1057_s23 = scalar_lea.hbm %s1143_s3, %s542_s24 }
  0x55   : > { %vm312_vm6 = vcmp.lt.f32.partialorder %v287_v9, 1.0  ;;  %v317_v13 = vsub.f32 1.0, %v286_v8  ;;  %v318_v15 = vsub.f32 1.0, %v287_v9  ;;  %s389_s11 = sshll.u32 %s269_s6, 4  ;;  %s363_s25 = scalar_lea.sflag [#allocation9], %s1006_s21  ;;  %s1059_s11 = int_to_ptr.vmem [resolvable:$true] %s389_s11 }
  0x56   : > { %v291_v3 = vadd.s32 8, %v290_v2  ;;  %v296_v4 = vadd.s32 %v295_v1, %v290_v2  ;;  %s707_s30 = scalar_lea.vmem %s1059_s11, 128  ;;  %p1162_p4 = scmp.ne.s32.totalorder %s1148_s28, 0 }
  0x57   : > { %v325_v24 = vmul.f32 %v317_v13, %v317_v13  ;;  %v326_v26 = vmul.f32 %v318_v15, %v318_v15  ;;  %p708_p2 = scmp.ne.s32.totalorder %s1059_s11, %s707_s30  ;;  %s849_s7 = smov [#allocation8]  }
  0x58   : > { %v297_v5 = vadd.s32 %v295_v1, %v291_v3  ;;  %vm298_vm0 = vcmp.lt.s32.totalorder %v296_v4, 16  ;;  %s711_s8 = sshll.u32 %s849_s7, 4  ;;  %s712_s8 = int_to_ptr.vmem [resolvable:$false] %s711_s8 }
  0x59   : > { %vm1012_vm5 = vmand %vm307_vm2, %vm298_vm0  ;;  %v327_v28 = vmul.f32 %v325_v24, %v325_v24  ;;  %p709_p12 = pnand %p708_p2, %p1162_p4  ;;  %s713_s9 = scalar_lea.vmem %s712_s8, 256 }
  0x5a   : > { %vm299_vm1 = vcmp.lt.s32.totalorder %v297_v5, 16  ;;  %v538_v17 = vsel %vm1012_vm5, 1.0, %v848_v16  ;;  %vm1025_vm8 = vmand %vm311_vm3, %vm298_vm0  ;;  %v319_v19 = vsel %vm1012_vm5, %v284_v6, %v315_v10  ;;  %p714_p0 = scmp.lt.s32.totalorder %s1059_s11, %s712_s8  ;;  %p715_p8 = scmp.lt.s32.totalorder %s713_s9, %s707_s30 }
  0x5b   : > { %vm1018_vm7 = vmand %vm308_vm4, %vm299_vm1  ;;  %p710_p13 = pneg %p709_p12 }
  0x5c   : > { %v539_v20 = vsel %vm1018_vm7, 1.0, %v848_v16  ;;  %vm1037_vm9 = vmand %vm312_vm6, %vm299_vm1  ;;  %v320_v22 = vsel %vm1018_vm7, %v1009_v7, %v316_v12  ;;  %p716_p9 = por %p715_p8, %p714_p0 }
  0x5d   : > { %v354_v23 = vadd.f32 %v539_v20, %v538_v17  ;;  %vm321_vm10 = vmor %vm1012_vm5, %vm1025_vm8 }
  0x5e   : > { %vm322_vm11 = vmor %vm1018_vm7, %vm1037_vm9  ;;  %v323_v25 = vsel %vm321_vm10, %v319_v19, 1.0  ;;  %p717_p10 = pnand %p716_p9, %p710_p13 }
  0x5f   : > { %v324_v27 = vsel %vm322_vm11, %v320_v22, 1.0  ;;  %647 = vlog2.f32 %v323_v25  ;;  %356 = vst [vmem:[%s269_s6] sm:$0xff] %v354_v23 }
  0x60   : > { %649 = vlog2.f32 %v324_v27 }
  0x61   : > { %720 = shalt.err (!%p717_p10)
}
  0x62   : > { %s721_s5 = scalar_lea.hbm %s1057_s23, 128  ;;  %s725_s6 = scalar_lea.hbm %s1143_s3, 256 }
  0x63   : > { %p722_p11 = scmp.ne.s32.totalorder %s1057_s23, %s721_s5  ;;  %p726_p7 = scmp.lt.s32.totalorder %s1057_s23, %s1143_s3 }
  0x64   : > { %p727_p6 = scmp.lt.s32.totalorder %s725_s6, %s721_s5 }
  0x65   : > { %p723_p1 = pnand %p722_p11, %p1162_p4 }
  0x66   : > { %p728_p5 = por %p727_p6, %p726_p7 }
  0x67   : > { %p724_p3 = pneg %p723_p1 }
  0x69   : > { %p729_p2 = pnand %p728_p5, %p724_p3 }
  0x6b   : > { %732 = shalt.err (!%p729_p2)
}
  0x6c   : > { %553 = dma.vmem_to_hbm [thread:$0]  (%p1162_p4), %s1059_s11, 128, %s1057_s23, %s363_s25   ;;  %v328_v30 = vmul.f32 %v326_v26, %v326_v26  ;;  %v332_v31 = vmul.f32 %v1009_v7, %v1009_v7  ;;  %v333_v32 = vmul.f32 %v331_v29, %v327_v28  ;;  %v329_v34 = vmul.f32 %v315_v10, %v315_v10  ;;  %v648_v38 = vpop.eup %647 }
  0x6d   : > { %v330_v35 = vmul.f32 %v316_v12, %v316_v12  ;;  %v650_v40 = vpop.eup %649  ;;  %v340_v42 = vmul.f32 0.6931472, %v648_v38  ;;  %s262_s11 = scalar_lea.vmem [#allocation7], %s535_s26  ;;  %s374_s7 = scalar_lea.hbm %s1142_s2, %s542_s24 }
  0x6e   : > { %v334_v33 = vmul.f32 %v332_v31, %v328_v30  ;;  %v335_v36 = vsel %vm1025_vm8, %v333_v32, 0.0  ;;  %v342_v43 = vmul.f32 0.6931472, %v650_v40  ;;  %s376_s23 = sshll.u32 %s262_s11, 4  ;;  %s358_s8 = scalar_lea.sflag [#allocation4], %s1006_s21  ;;  %s377_s23 = int_to_ptr.vmem [resolvable:$true] %s376_s23 }
  0x6f   : > { %v337_v39 = vsel %vm1012_vm5, %v329_v34, %v335_v36  ;;  %s733_s9 = scalar_lea.vmem %s377_s23, 128  ;;  %s850_s5 = smov [#allocation7]  }
  0x70   : > { %v336_v37 = vsel %vm1037_vm9, %v334_v33, 0.0  ;;  %v343_v44 = vmul.f32 %v340_v42, %v337_v39  ;;  %p734_p12 = scmp.ne.s32.totalorder %s377_s23, %s733_s9  ;;  %s737_s10 = sshll.u32 %s850_s5, 4  ;;  %s738_s10 = int_to_ptr.vmem [resolvable:$false] %s737_s10 }
  0x71   : > { %v338_v41 = vsel %vm1018_vm7, %v330_v35, %v336_v37  ;;  %s739_s20 = scalar_lea.vmem %s738_s10, 256  ;;  %p740_p8 = scmp.lt.s32.totalorder %s377_s23, %s738_s10 }
  0x72   : > { %v344_v45 = vmul.f32 %v342_v43, %v338_v41  ;;  %p735_p13 = pnand %p734_p12, %p1162_p4  ;;  %p741_p9 = scmp.lt.s32.totalorder %s739_s20, %s733_s9 }
  0x74   : > { %v346_v46 = vadd.f32 %v344_v45, %v343_v44  ;;  %p736_p0 = pneg %p735_p13  ;;  %p742_p10 = por %p741_p9, %p740_p8 }
  0x76   : > { %348 = vst [vmem:[%s262_s11] sm:$0xff] %v346_v46  ;;  %p743_p11 = pnand %p742_p10, %p736_p0 }
  0x78   : > { %746 = shalt.err (!%p743_p11)
}
  0x79   : > { %s747_s17 = scalar_lea.hbm %s374_s7, 128  ;;  %s751_s24 = scalar_lea.hbm %s1142_s2, 256 }
  0x7a   : > { %p748_p1 = scmp.ne.s32.totalorder %s374_s7, %s747_s17  ;;  %p752_p6 = scmp.lt.s32.totalorder %s374_s7, %s1142_s2 }
  0x7b   : > { %p753_p5 = scmp.lt.s32.totalorder %s751_s24, %s747_s17 }
  0x7c   : > { %p749_p3 = pnand %p748_p1, %p1162_p4 }
  0x7d   : > { %p754_p2 = por %p753_p5, %p752_p6 }
  0x7e   : > { %p750_p7 = pneg %p749_p3 }
  0x80   : > { %p755_p12 = pnand %p754_p2, %p750_p7 }
  0x82   : > { %758 = shalt.err (!%p755_p12)
}
  0x83   : > { %552 = dma.vmem_to_hbm [thread:$0]  (%p1162_p4), %s377_s23, 128, %s374_s7, %s358_s8  }
  0x84 PF: > { %s401_s15 = sand.u32 1, %s814_s12   ;;  %p1163_p13 = scmp.ne.s32.totalorder %s1149_s29, 0 }
  0x85   : > { %p1164_p0 = scmp.ge.s32.totalorder %s842_s19, 2  ;;  %s402_s11 = scalar_lea.sflag [#allocation4], %s401_s15 }
  0x87   : > { %p564_p8 = pnand %p1164_p0, %p1163_p13 }
  0x89   : > { %p565_p9 = pneg %p564_p8 }
  0x8b   : > { %804 = dma.done.wait (%p565_p9), %s402_s11, 128  }
  0x8c   : > { %806 = vsyncadd (%p565_p9), %s402_s11, 4294967168  ;;  %s411_s25 = scalar_lea.sflag [#allocation9], %s401_s15 }
  0x8d   : > { %808 = dma.done.wait (%p565_p9), %s411_s25, 128  }
  0x8e   : > { %810 = vsyncadd (%p565_p9), %s411_s25, 4294967168  ;;  %s26_s19 = sadd.s32 1, %s842_s19   ;;  %s1165_s12 = smov %s818_s13 }
  0x8f   : > { %p23_p10 = scmp.ge.s32.totalorder %s26_s19, 4   ;;  %s1166_s13 = smov %s822_s14 }
  0x90   : > { %s1167_s14 = smov %s929_s27  ;;  %s1168_s15 = smov %s830_s16 }
  0x91   : > { %s1130_s16 = smov 0   ;;  %s1169_s17 = smov %s838_s18 }
  0x92   : > { %s1170_s18 = smov %s1172_s22  ;;  %25 = sbr.rel (!%p23_p10) target bundleno = 11 (0xb), region = 107 }
  0x97   :  { %416 = vsyncpa [#allocation3], 1 }
  0x98   :  { %418 = vsyncpa [#allocation3 + $0x1], 1 }
  0x99   :  { %419 = vsyncpa [#allocation6], 1 }
  0x9a   :  { %421 = vsyncpa [#allocation6 + $0x1], 1 }
  0x9b   :  { %422 = vsyncpa [#allocation4], 1 }
  0x9c   :  { %424 = vsyncpa [#allocation4 + $0x1], 1 }
  0x9d   :  { %425 = vsyncpa [#allocation9], 1 }
  0x9e   :  { %427 = vsyncpa [#allocation9 + $0x1], 1 }

</bundles_post_ra>
